<compile_context>
chip_gen: v6e
topology: v6e:2x2x1
jax: 0.10.0
libtpu: 0.0.40
codegen_flags: <defaults>
</compile_context>

<pallas_src>
import numpy as np
import jax
import jax.numpy as jnp
from jax.experimental import pallas as pl
from jax.experimental.pallas import tpu as pltpu

# ---- problem sizes (small, consistent with the module) ---------------------
BATCH = 2
SEQ_LEN = 8
VOCAB = 128
EMB = 128          # multiple of 128 lanes -> lane-dense output tiles
PAD_IDX = 0
DROPOUT_P = 0.2    # TODO(synk): training-mode dropout (pltpu.prng_*) not applied; eval-mode identity.

ROWS = 8           # token rows gathered per grid step == in-flight DMA depth.
                   # (ROWS, EMB) = (8, 128) keeps the output tile aligned; raise
                   # to 16+ at production sizes for deeper DMA overlap (v7x).


# ---- kernel: gather ROWS embedding rows from the HBM-resident table --------
def _gather_rows_kernel(ids_ref, w_hbm, out_ref, rows_buf, sems):
    # ids_ref : SMEM (n_tok_padded,) int32  scalar-prefetched token ids
    # w_hbm   : ANY  (V, E)          f32    embedding table, stays in HBM
    # out_ref : VMEM (ROWS, E)       f32    gathered rows (lane-dense tile)
    # rows_buf: VMEM (ROWS, E)       f32    DMA landing buffer
    # sems    : DMA semaphores, one per in-flight row copy
    t = pl.program_id(0)
    base = t * ROWS

    # Read all ids (scalar SMEM loads) and issue all ROWS row-DMAs *before*
    # waiting on any of them -> in-flight depth == ROWS hides per-row latency.
    # (Scalar reads are kept before the first .wait(): sst->sld forwarding.)
    copies = []
    for r in range(ROWS):
        tok = ids_ref[base + r]
        cp = pltpu.make_async_copy(
            w_hbm.at[pl.ds(tok, 1), :],       # (1, E) row of the HBM table
            rows_buf.at[pl.ds(r, 1), :],      # (1, E) slot of the landing buffer
            sems.at[r],
        )
        cp.start()
        copies.append(cp)
    for cp in copies:
        cp.wait()

    out_ref[...] = rows_buf[...]              # full (ROWS, E) unmasked store


# ---- module forward (hot path, fully on device) -----------------------------
@jax.jit
def embedding_forward(indices, weight):
    """Returns full-length emb_out (B, L, E), lengths (B,), masks (B, L)."""
    B, L = indices.shape
    V, E = weight.shape
    n_tok = B * L
    n_pad = pl.cdiv(n_tok, ROWS) * ROWS

    ids = indices.reshape(n_tok).astype(jnp.int32)
    ids = jnp.clip(ids, 0, V - 1)             # PyTorch errors on OOB ids; we clamp
    ids = jnp.pad(ids, (0, n_pad - n_tok), constant_values=PAD_IDX)

    emb_flat = pl.pallas_call(
        _gather_rows_kernel,
        out_shape=jax.ShapeDtypeStruct((n_pad, E), jnp.float32),
        grid_spec=pltpu.PrefetchScalarGridSpec(
            num_scalar_prefetch=1,            # ids -> SMEM, drive the row gather
            grid=(n_pad // ROWS,),
            in_specs=[pl.BlockSpec(memory_space=pl.ANY)],   # table stays in HBM
            out_specs=pl.BlockSpec((ROWS, E), lambda t, ids: (t, 0)),
            scratch_shapes=[
                pltpu.VMEM((ROWS, E), jnp.float32),
                pltpu.SemaphoreType.DMA((ROWS,)),
            ],
        ),
        compiler_params=pltpu.CompilerParams(
            dimension_semantics=("parallel",),          # v7x: 2 TCs split tiles
            vmem_limit_bytes=32 * 1024 * 1024,
        ),
    )(ids, weight)

    emb_out = emb_flat[:n_tok].reshape(B, L, E)

    # Trivial elementwise mask / lengths computed in XLA (per perf review); this
    # avoids a duplicated VMEM index stream and masked sub-lane stores.
    masks = indices != PAD_IDX
    lengths = jnp.sum(masks, axis=-1).astype(jnp.int32)
    return emb_out, lengths, masks


def sliced_forward(indices, weight):
    """Reproduces the module's exact return contract (dynamic max-length slice)."""
    emb_out, lengths, masks = embedding_forward(indices, weight)
    jax.block_until_ready((emb_out, lengths, masks))
    max_len = int(jnp.max(lengths))           # one host sync, outside the jit
    return emb_out[:, :max_len], lengths, masks[:, :max_len]


# ---- reference (plain numpy) for a sanity check ------------------------------
def reference_forward(indices, weight):
    idx = np.asarray(indices)
    w = np.asarray(weight)
    emb = w[idx]                              # (B, L, E)
    masks = idx != PAD_IDX
    lengths = masks.sum(-1)
    max_len = int(lengths.max())
    return emb[:, :max_len], lengths, masks[:, :max_len]


if __name__ == "__main__":
    key = jax.random.PRNGKey(0)
    k_w, k_i = jax.random.split(key)

    # deterministic table; zero the padding_idx row (nn.Embedding behavior)
    weight = jax.random.normal(k_w, (VOCAB, EMB), dtype=jnp.float32)
    weight = weight.at[PAD_IDX].set(0.0)

    # deterministic token ids with trailing padding to exercise lengths/masks
    indices = jax.random.randint(k_i, (BATCH, SEQ_LEN), 1, VOCAB, dtype=jnp.int32)
    indices = indices.at[0, 6:].set(PAD_IDX)
    indices = indices.at[1, 4:].set(PAD_IDX)

    emb_out, lengths, masks = sliced_forward(indices, weight)
    jax.block_until_ready((emb_out, lengths, masks))

    ref_emb, ref_len, ref_mask = reference_forward(indices, weight)
    assert emb_out.shape == ref_emb.shape, (emb_out.shape, ref_emb.shape)
    np.testing.assert_allclose(np.asarray(emb_out), ref_emb, rtol=1e-6, atol=1e-6)
    np.testing.assert_array_equal(np.asarray(lengths), ref_len)
    np.testing.assert_array_equal(np.asarray(masks), ref_mask)

    print("KERNEL_OK")
</pallas_src>

<mosaic_0001>
module attributes {stable_mosaic.version = 11 : i64} {
  func.func @_gather_rows_kernel(%arg0: i32, %arg1: memref<16xi32, #tpu.memory_space<smem>>, %arg2: memref<128x128xf32, #tpu.memory_space<any>>, %arg3: memref<8x128xf32, #tpu.memory_space<vmem>>, %arg4: memref<8x128xf32, #tpu.memory_space<vmem>>, %arg5: memref<8x!tpu.dma_semaphore, #tpu.memory_space<semaphore_mem>>) attributes {dimension_semantics = [#tpu.dimension_semantics<parallel>], iteration_bounds = array<i64: 2>, scalar_prefetch = 1 : i64, scratch_operands = 2 : i64, tpu.core_type = #tpu.core_type<tc>, window_params = [{}, {transform_indices = @transform_1, window_bounds = array<i64: 8, 128>}]} {
    %c8_i32 = arith.constant 8 : i32
    %0 = arith.muli %arg0, %c8_i32 : i32
    %c0_i32 = arith.constant 0 : i32
    %1 = arith.addi %0, %c0_i32 : i32
    %2 = arith.index_cast %1 : i32 to index
    %3 = memref.load %arg1[%2] : memref<16xi32, #tpu.memory_space<smem>>
    %c0_i32_0 = arith.constant 0 : i32
    %c0_i32_1 = arith.constant 0 : i32
    %4 = tpu.memref_slice %arg2[%3, %c0_i32_1] : memref<128x128xf32, #tpu.memory_space<any>> -> memref<1x128xf32, #tpu.memory_space<any>>
    %c0_i32_2 = arith.constant 0 : i32
    %c0_i32_3 = arith.constant 0 : i32
    %5 = tpu.memref_slice %arg4[%c0_i32_2, %c0_i32_3] : memref<8x128xf32, #tpu.memory_space<vmem>> -> memref<1x128xf32, #tpu.memory_space<vmem>>
    %6 = tpu.memref_slice %arg5[%c0_i32_0] : memref<8x!tpu.dma_semaphore, #tpu.memory_space<semaphore_mem>> -> memref<1x!tpu.dma_semaphore, #tpu.memory_space<semaphore_mem>>
    %7 = tpu.memref_squeeze %6 : memref<1x!tpu.dma_semaphore, #tpu.memory_space<semaphore_mem>> -> memref<!tpu.dma_semaphore, #tpu.memory_space<semaphore_mem>>
    tpu.enqueue_dma source(%4 : memref<1x128xf32, #tpu.memory_space<any>>) target(%5 : memref<1x128xf32, #tpu.memory_space<vmem>>) target_semaphore(%7 : memref<!tpu.dma_semaphore, #tpu.memory_space<semaphore_mem>>)
    %c1_i32 = arith.constant 1 : i32
    %8 = arith.addi %0, %c1_i32 : i32
    %9 = arith.index_cast %8 : i32 to index
    %10 = memref.load %arg1[%9] : memref<16xi32, #tpu.memory_space<smem>>
    %c1_i32_4 = arith.constant 1 : i32
    %c0_i32_5 = arith.constant 0 : i32
    %11 = tpu.memref_slice %arg2[%10, %c0_i32_5] : memref<128x128xf32, #tpu.memory_space<any>> -> memref<1x128xf32, #tpu.memory_space<any>>
    %c1_i32_6 = arith.constant 1 : i32
    %c0_i32_7 = arith.constant 0 : i32
    %12 = tpu.memref_slice %arg4[%c1_i32_6, %c0_i32_7] : memref<8x128xf32, #tpu.memory_space<vmem>> -> memref<1x128xf32, #tpu.memory_space<vmem>>
    %13 = tpu.memref_slice %arg5[%c1_i32_4] : memref<8x!tpu.dma_semaphore, #tpu.memory_space<semaphore_mem>> -> memref<1x!tpu.dma_semaphore, #tpu.memory_space<semaphore_mem>>
    %14 = tpu.memref_squeeze %13 : memref<1x!tpu.dma_semaphore, #tpu.memory_space<semaphore_mem>> -> memref<!tpu.dma_semaphore, #tpu.memory_space<semaphore_mem>>
    tpu.enqueue_dma source(%11 : memref<1x128xf32, #tpu.memory_space<any>>) target(%12 : memref<1x128xf32, #tpu.memory_space<vmem>>) target_semaphore(%14 : memref<!tpu.dma_semaphore, #tpu.memory_space<semaphore_mem>>)
    %c2_i32 = arith.constant 2 : i32
    %15 = arith.addi %0, %c2_i32 : i32
    %16 = arith.index_cast %15 : i32 to index
    %17 = memref.load %arg1[%16] : memref<16xi32, #tpu.memory_space<smem>>
    %c2_i32_8 = arith.constant 2 : i32
    %c0_i32_9 = arith.constant 0 : i32
    %18 = tpu.memref_slice %arg2[%17, %c0_i32_9] : memref<128x128xf32, #tpu.memory_space<any>> -> memref<1x128xf32, #tpu.memory_space<any>>
    %c2_i32_10 = arith.constant 2 : i32
    %c0_i32_11 = arith.constant 0 : i32
    %19 = tpu.memref_slice %arg4[%c2_i32_10, %c0_i32_11] : memref<8x128xf32, #tpu.memory_space<vmem>> -> memref<1x128xf32, #tpu.memory_space<vmem>>
    %20 = tpu.memref_slice %arg5[%c2_i32_8] : memref<8x!tpu.dma_semaphore, #tpu.memory_space<semaphore_mem>> -> memref<1x!tpu.dma_semaphore, #tpu.memory_space<semaphore_mem>>
    %21 = tpu.memref_squeeze %20 : memref<1x!tpu.dma_semaphore, #tpu.memory_space<semaphore_mem>> -> memref<!tpu.dma_semaphore, #tpu.memory_space<semaphore_mem>>
    tpu.enqueue_dma source(%18 : memref<1x128xf32, #tpu.memory_space<any>>) target(%19 : memref<1x128xf32, #tpu.memory_space<vmem>>) target_semaphore(%21 : memref<!tpu.dma_semaphore, #tpu.memory_space<semaphore_mem>>)
    %c3_i32 = arith.constant 3 : i32
    %22 = arith.addi %0, %c3_i32 : i32
    %23 = arith.index_cast %22 : i32 to index
    %24 = memref.load %arg1[%23] : memref<16xi32, #tpu.memory_space<smem>>
    %c3_i32_12 = arith.constant 3 : i32
    %c0_i32_13 = arith.constant 0 : i32
    %25 = tpu.memref_slice %arg2[%24, %c0_i32_13] : memref<128x128xf32, #tpu.memory_space<any>> -> memref<1x128xf32, #tpu.memory_space<any>>
    %c3_i32_14 = arith.constant 3 : i32
    %c0_i32_15 = arith.constant 0 : i32
    %26 = tpu.memref_slice %arg4[%c3_i32_14, %c0_i32_15] : memref<8x128xf32, #tpu.memory_space<vmem>> -> memref<1x128xf32, #tpu.memory_space<vmem>>
    %27 = tpu.memref_slice %arg5[%c3_i32_12] : memref<8x!tpu.dma_semaphore, #tpu.memory_space<semaphore_mem>> -> memref<1x!tpu.dma_semaphore, #tpu.memory_space<semaphore_mem>>
    %28 = tpu.memref_squeeze %27 : memref<1x!tpu.dma_semaphore, #tpu.memory_space<semaphore_mem>> -> memref<!tpu.dma_semaphore, #tpu.memory_space<semaphore_mem>>
    tpu.enqueue_dma source(%25 : memref<1x128xf32, #tpu.memory_space<any>>) target(%26 : memref<1x128xf32, #tpu.memory_space<vmem>>) target_semaphore(%28 : memref<!tpu.dma_semaphore, #tpu.memory_space<semaphore_mem>>)
    %c4_i32 = arith.constant 4 : i32
    %29 = arith.addi %0, %c4_i32 : i32
    %30 = arith.index_cast %29 : i32 to index
    %31 = memref.load %arg1[%30] : memref<16xi32, #tpu.memory_space<smem>>
    %c4_i32_16 = arith.constant 4 : i32
    %c0_i32_17 = arith.constant 0 : i32
    %32 = tpu.memref_slice %arg2[%31, %c0_i32_17] : memref<128x128xf32, #tpu.memory_space<any>> -> memref<1x128xf32, #tpu.memory_space<any>>
    %c4_i32_18 = arith.constant 4 : i32
    %c0_i32_19 = arith.constant 0 : i32
    %33 = tpu.memref_slice %arg4[%c4_i32_18, %c0_i32_19] : memref<8x128xf32, #tpu.memory_space<vmem>> -> memref<1x128xf32, #tpu.memory_space<vmem>>
    %34 = tpu.memref_slice %arg5[%c4_i32_16] : memref<8x!tpu.dma_semaphore, #tpu.memory_space<semaphore_mem>> -> memref<1x!tpu.dma_semaphore, #tpu.memory_space<semaphore_mem>>
    %35 = tpu.memref_squeeze %34 : memref<1x!tpu.dma_semaphore, #tpu.memory_space<semaphore_mem>> -> memref<!tpu.dma_semaphore, #tpu.memory_space<semaphore_mem>>
    tpu.enqueue_dma source(%32 : memref<1x128xf32, #tpu.memory_space<any>>) target(%33 : memref<1x128xf32, #tpu.memory_space<vmem>>) target_semaphore(%35 : memref<!tpu.dma_semaphore, #tpu.memory_space<semaphore_mem>>)
    %c5_i32 = arith.constant 5 : i32
    %36 = arith.addi %0, %c5_i32 : i32
    %37 = arith.index_cast %36 : i32 to index
    %38 = memref.load %arg1[%37] : memref<16xi32, #tpu.memory_space<smem>>
    %c5_i32_20 = arith.constant 5 : i32
    %c0_i32_21 = arith.constant 0 : i32
    %39 = tpu.memref_slice %arg2[%38, %c0_i32_21] : memref<128x128xf32, #tpu.memory_space<any>> -> memref<1x128xf32, #tpu.memory_space<any>>
    %c5_i32_22 = arith.constant 5 : i32
    %c0_i32_23 = arith.constant 0 : i32
    %40 = tpu.memref_slice %arg4[%c5_i32_22, %c0_i32_23] : memref<8x128xf32, #tpu.memory_space<vmem>> -> memref<1x128xf32, #tpu.memory_space<vmem>>
    %41 = tpu.memref_slice %arg5[%c5_i32_20] : memref<8x!tpu.dma_semaphore, #tpu.memory_space<semaphore_mem>> -> memref<1x!tpu.dma_semaphore, #tpu.memory_space<semaphore_mem>>
    %42 = tpu.memref_squeeze %41 : memref<1x!tpu.dma_semaphore, #tpu.memory_space<semaphore_mem>> -> memref<!tpu.dma_semaphore, #tpu.memory_space<semaphore_mem>>
    tpu.enqueue_dma source(%39 : memref<1x128xf32, #tpu.memory_space<any>>) target(%40 : memref<1x128xf32, #tpu.memory_space<vmem>>) target_semaphore(%42 : memref<!tpu.dma_semaphore, #tpu.memory_space<semaphore_mem>>)
    %c6_i32 = arith.constant 6 : i32
    %43 = arith.addi %0, %c6_i32 : i32
    %44 = arith.index_cast %43 : i32 to index
    %45 = memref.load %arg1[%44] : memref<16xi32, #tpu.memory_space<smem>>
    %c6_i32_24 = arith.constant 6 : i32
    %c0_i32_25 = arith.constant 0 : i32
    %46 = tpu.memref_slice %arg2[%45, %c0_i32_25] : memref<128x128xf32, #tpu.memory_space<any>> -> memref<1x128xf32, #tpu.memory_space<any>>
    %c6_i32_26 = arith.constant 6 : i32
    %c0_i32_27 = arith.constant 0 : i32
    %47 = tpu.memref_slice %arg4[%c6_i32_26, %c0_i32_27] : memref<8x128xf32, #tpu.memory_space<vmem>> -> memref<1x128xf32, #tpu.memory_space<vmem>>
    %48 = tpu.memref_slice %arg5[%c6_i32_24] : memref<8x!tpu.dma_semaphore, #tpu.memory_space<semaphore_mem>> -> memref<1x!tpu.dma_semaphore, #tpu.memory_space<semaphore_mem>>
    %49 = tpu.memref_squeeze %48 : memref<1x!tpu.dma_semaphore, #tpu.memory_space<semaphore_mem>> -> memref<!tpu.dma_semaphore, #tpu.memory_space<semaphore_mem>>
    tpu.enqueue_dma source(%46 : memref<1x128xf32, #tpu.memory_space<any>>) target(%47 : memref<1x128xf32, #tpu.memory_space<vmem>>) target_semaphore(%49 : memref<!tpu.dma_semaphore, #tpu.memory_space<semaphore_mem>>)
    %c7_i32 = arith.constant 7 : i32
    %50 = arith.addi %0, %c7_i32 : i32
    %51 = arith.index_cast %50 : i32 to index
    %52 = memref.load %arg1[%51] : memref<16xi32, #tpu.memory_space<smem>>
    %c7_i32_28 = arith.constant 7 : i32
    %c0_i32_29 = arith.constant 0 : i32
    %53 = tpu.memref_slice %arg2[%52, %c0_i32_29] : memref<128x128xf32, #tpu.memory_space<any>> -> memref<1x128xf32, #tpu.memory_space<any>>
    %c7_i32_30 = arith.constant 7 : i32
    %c0_i32_31 = arith.constant 0 : i32
    %54 = tpu.memref_slice %arg4[%c7_i32_30, %c0_i32_31] : memref<8x128xf32, #tpu.memory_space<vmem>> -> memref<1x128xf32, #tpu.memory_space<vmem>>
    %55 = tpu.memref_slice %arg5[%c7_i32_28] : memref<8x!tpu.dma_semaphore, #tpu.memory_space<semaphore_mem>> -> memref<1x!tpu.dma_semaphore, #tpu.memory_space<semaphore_mem>>
    %56 = tpu.memref_squeeze %55 : memref<1x!tpu.dma_semaphore, #tpu.memory_space<semaphore_mem>> -> memref<!tpu.dma_semaphore, #tpu.memory_space<semaphore_mem>>
    tpu.enqueue_dma source(%53 : memref<1x128xf32, #tpu.memory_space<any>>) target(%54 : memref<1x128xf32, #tpu.memory_space<vmem>>) target_semaphore(%56 : memref<!tpu.dma_semaphore, #tpu.memory_space<semaphore_mem>>)
    %c0_i32_32 = arith.constant 0 : i32
    %c0_i32_33 = arith.constant 0 : i32
    %57 = tpu.memref_slice %arg2[%3, %c0_i32_33] : memref<128x128xf32, #tpu.memory_space<any>> -> memref<1x128xf32, #tpu.memory_space<any>>
    %c0_i32_34 = arith.constant 0 : i32
    %c0_i32_35 = arith.constant 0 : i32
    %58 = tpu.memref_slice %arg4[%c0_i32_34, %c0_i32_35] : memref<8x128xf32, #tpu.memory_space<vmem>> -> memref<1x128xf32, #tpu.memory_space<vmem>>
    %59 = tpu.memref_slice %arg5[%c0_i32_32] : memref<8x!tpu.dma_semaphore, #tpu.memory_space<semaphore_mem>> -> memref<1x!tpu.dma_semaphore, #tpu.memory_space<semaphore_mem>>
    %60 = tpu.memref_squeeze %59 : memref<1x!tpu.dma_semaphore, #tpu.memory_space<semaphore_mem>> -> memref<!tpu.dma_semaphore, #tpu.memory_space<semaphore_mem>>
    tpu.wait_dma2 semaphore(%60 : memref<!tpu.dma_semaphore, #tpu.memory_space<semaphore_mem>>) src(%57 : memref<1x128xf32, #tpu.memory_space<any>>) dst(%58 : memref<1x128xf32, #tpu.memory_space<vmem>>)
    %c1_i32_36 = arith.constant 1 : i32
    %c0_i32_37 = arith.constant 0 : i32
    %61 = tpu.memref_slice %arg2[%10, %c0_i32_37] : memref<128x128xf32, #tpu.memory_space<any>> -> memref<1x128xf32, #tpu.memory_space<any>>
    %c1_i32_38 = arith.constant 1 : i32
    %c0_i32_39 = arith.constant 0 : i32
    %62 = tpu.memref_slice %arg4[%c1_i32_38, %c0_i32_39] : memref<8x128xf32, #tpu.memory_space<vmem>> -> memref<1x128xf32, #tpu.memory_space<vmem>>
    %63 = tpu.memref_slice %arg5[%c1_i32_36] : memref<8x!tpu.dma_semaphore, #tpu.memory_space<semaphore_mem>> -> memref<1x!tpu.dma_semaphore, #tpu.memory_space<semaphore_mem>>
    %64 = tpu.memref_squeeze %63 : memref<1x!tpu.dma_semaphore, #tpu.memory_space<semaphore_mem>> -> memref<!tpu.dma_semaphore, #tpu.memory_space<semaphore_mem>>
    tpu.wait_dma2 semaphore(%64 : memref<!tpu.dma_semaphore, #tpu.memory_space<semaphore_mem>>) src(%61 : memref<1x128xf32, #tpu.memory_space<any>>) dst(%62 : memref<1x128xf32, #tpu.memory_space<vmem>>)
    %c2_i32_40 = arith.constant 2 : i32
    %c0_i32_41 = arith.constant 0 : i32
    %65 = tpu.memref_slice %arg2[%17, %c0_i32_41] : memref<128x128xf32, #tpu.memory_space<any>> -> memref<1x128xf32, #tpu.memory_space<any>>
    %c2_i32_42 = arith.constant 2 : i32
    %c0_i32_43 = arith.constant 0 : i32
    %66 = tpu.memref_slice %arg4[%c2_i32_42, %c0_i32_43] : memref<8x128xf32, #tpu.memory_space<vmem>> -> memref<1x128xf32, #tpu.memory_space<vmem>>
    %67 = tpu.memref_slice %arg5[%c2_i32_40] : memref<8x!tpu.dma_semaphore, #tpu.memory_space<semaphore_mem>> -> memref<1x!tpu.dma_semaphore, #tpu.memory_space<semaphore_mem>>
    %68 = tpu.memref_squeeze %67 : memref<1x!tpu.dma_semaphore, #tpu.memory_space<semaphore_mem>> -> memref<!tpu.dma_semaphore, #tpu.memory_space<semaphore_mem>>
    tpu.wait_dma2 semaphore(%68 : memref<!tpu.dma_semaphore, #tpu.memory_space<semaphore_mem>>) src(%65 : memref<1x128xf32, #tpu.memory_space<any>>) dst(%66 : memref<1x128xf32, #tpu.memory_space<vmem>>)
    %c3_i32_44 = arith.constant 3 : i32
    %c0_i32_45 = arith.constant 0 : i32
    %69 = tpu.memref_slice %arg2[%24, %c0_i32_45] : memref<128x128xf32, #tpu.memory_space<any>> -> memref<1x128xf32, #tpu.memory_space<any>>
    %c3_i32_46 = arith.constant 3 : i32
    %c0_i32_47 = arith.constant 0 : i32
    %70 = tpu.memref_slice %arg4[%c3_i32_46, %c0_i32_47] : memref<8x128xf32, #tpu.memory_space<vmem>> -> memref<1x128xf32, #tpu.memory_space<vmem>>
    %71 = tpu.memref_slice %arg5[%c3_i32_44] : memref<8x!tpu.dma_semaphore, #tpu.memory_space<semaphore_mem>> -> memref<1x!tpu.dma_semaphore, #tpu.memory_space<semaphore_mem>>
    %72 = tpu.memref_squeeze %71 : memref<1x!tpu.dma_semaphore, #tpu.memory_space<semaphore_mem>> -> memref<!tpu.dma_semaphore, #tpu.memory_space<semaphore_mem>>
    tpu.wait_dma2 semaphore(%72 : memref<!tpu.dma_semaphore, #tpu.memory_space<semaphore_mem>>) src(%69 : memref<1x128xf32, #tpu.memory_space<any>>) dst(%70 : memref<1x128xf32, #tpu.memory_space<vmem>>)
    %c4_i32_48 = arith.constant 4 : i32
    %c0_i32_49 = arith.constant 0 : i32
    %73 = tpu.memref_slice %arg2[%31, %c0_i32_49] : memref<128x128xf32, #tpu.memory_space<any>> -> memref<1x128xf32, #tpu.memory_space<any>>
    %c4_i32_50 = arith.constant 4 : i32
    %c0_i32_51 = arith.constant 0 : i32
    %74 = tpu.memref_slice %arg4[%c4_i32_50, %c0_i32_51] : memref<8x128xf32, #tpu.memory_space<vmem>> -> memref<1x128xf32, #tpu.memory_space<vmem>>
    %75 = tpu.memref_slice %arg5[%c4_i32_48] : memref<8x!tpu.dma_semaphore, #tpu.memory_space<semaphore_mem>> -> memref<1x!tpu.dma_semaphore, #tpu.memory_space<semaphore_mem>>
    %76 = tpu.memref_squeeze %75 : memref<1x!tpu.dma_semaphore, #tpu.memory_space<semaphore_mem>> -> memref<!tpu.dma_semaphore, #tpu.memory_space<semaphore_mem>>
    tpu.wait_dma2 semaphore(%76 : memref<!tpu.dma_semaphore, #tpu.memory_space<semaphore_mem>>) src(%73 : memref<1x128xf32, #tpu.memory_space<any>>) dst(%74 : memref<1x128xf32, #tpu.memory_space<vmem>>)
    %c5_i32_52 = arith.constant 5 : i32
    %c0_i32_53 = arith.constant 0 : i32
    %77 = tpu.memref_slice %arg2[%38, %c0_i32_53] : memref<128x128xf32, #tpu.memory_space<any>> -> memref<1x128xf32, #tpu.memory_space<any>>
    %c5_i32_54 = arith.constant 5 : i32
    %c0_i32_55 = arith.constant 0 : i32
    %78 = tpu.memref_slice %arg4[%c5_i32_54, %c0_i32_55] : memref<8x128xf32, #tpu.memory_space<vmem>> -> memref<1x128xf32, #tpu.memory_space<vmem>>
    %79 = tpu.memref_slice %arg5[%c5_i32_52] : memref<8x!tpu.dma_semaphore, #tpu.memory_space<semaphore_mem>> -> memref<1x!tpu.dma_semaphore, #tpu.memory_space<semaphore_mem>>
    %80 = tpu.memref_squeeze %79 : memref<1x!tpu.dma_semaphore, #tpu.memory_space<semaphore_mem>> -> memref<!tpu.dma_semaphore, #tpu.memory_space<semaphore_mem>>
    tpu.wait_dma2 semaphore(%80 : memref<!tpu.dma_semaphore, #tpu.memory_space<semaphore_mem>>) src(%77 : memref<1x128xf32, #tpu.memory_space<any>>) dst(%78 : memref<1x128xf32, #tpu.memory_space<vmem>>)
    %c6_i32_56 = arith.constant 6 : i32
    %c0_i32_57 = arith.constant 0 : i32
    %81 = tpu.memref_slice %arg2[%45, %c0_i32_57] : memref<128x128xf32, #tpu.memory_space<any>> -> memref<1x128xf32, #tpu.memory_space<any>>
    %c6_i32_58 = arith.constant 6 : i32
    %c0_i32_59 = arith.constant 0 : i32
    %82 = tpu.memref_slice %arg4[%c6_i32_58, %c0_i32_59] : memref<8x128xf32, #tpu.memory_space<vmem>> -> memref<1x128xf32, #tpu.memory_space<vmem>>
    %83 = tpu.memref_slice %arg5[%c6_i32_56] : memref<8x!tpu.dma_semaphore, #tpu.memory_space<semaphore_mem>> -> memref<1x!tpu.dma_semaphore, #tpu.memory_space<semaphore_mem>>
    %84 = tpu.memref_squeeze %83 : memref<1x!tpu.dma_semaphore, #tpu.memory_space<semaphore_mem>> -> memref<!tpu.dma_semaphore, #tpu.memory_space<semaphore_mem>>
    tpu.wait_dma2 semaphore(%84 : memref<!tpu.dma_semaphore, #tpu.memory_space<semaphore_mem>>) src(%81 : memref<1x128xf32, #tpu.memory_space<any>>) dst(%82 : memref<1x128xf32, #tpu.memory_space<vmem>>)
    %c7_i32_60 = arith.constant 7 : i32
    %c0_i32_61 = arith.constant 0 : i32
    %85 = tpu.memref_slice %arg2[%52, %c0_i32_61] : memref<128x128xf32, #tpu.memory_space<any>> -> memref<1x128xf32, #tpu.memory_space<any>>
    %c7_i32_62 = arith.constant 7 : i32
    %c0_i32_63 = arith.constant 0 : i32
    %86 = tpu.memref_slice %arg4[%c7_i32_62, %c0_i32_63] : memref<8x128xf32, #tpu.memory_space<vmem>> -> memref<1x128xf32, #tpu.memory_space<vmem>>
    %87 = tpu.memref_slice %arg5[%c7_i32_60] : memref<8x!tpu.dma_semaphore, #tpu.memory_space<semaphore_mem>> -> memref<1x!tpu.dma_semaphore, #tpu.memory_space<semaphore_mem>>
    %88 = tpu.memref_squeeze %87 : memref<1x!tpu.dma_semaphore, #tpu.memory_space<semaphore_mem>> -> memref<!tpu.dma_semaphore, #tpu.memory_space<semaphore_mem>>
    tpu.wait_dma2 semaphore(%88 : memref<!tpu.dma_semaphore, #tpu.memory_space<semaphore_mem>>) src(%85 : memref<1x128xf32, #tpu.memory_space<any>>) dst(%86 : memref<1x128xf32, #tpu.memory_space<vmem>>)
    %c0 = arith.constant 0 : index
    %c0_64 = arith.constant 0 : index
    %89 = vector.load %arg4[%c0, %c0_64] : memref<8x128xf32, #tpu.memory_space<vmem>>, vector<8x128xf32>
    %c0_65 = arith.constant 0 : index
    %c0_66 = arith.constant 0 : index
    %90 = vector.load %arg3[%c0_65, %c0_66] : memref<8x128xf32, #tpu.memory_space<vmem>>, vector<8x128xf32>
    tpu.vector_store %arg3[%c0_65, %c0_66], %89 {strides = array<i32>} : memref<8x128xf32, #tpu.memory_space<vmem>>, vector<8x128xf32>,
    return
  }
  func.func @transform_1(%arg0: i32, %arg1: memref<16xi32, #tpu.memory_space<smem>>) -> (i32, i32) {
    %c0_i32 = arith.constant 0 : i32
    %c0_i32_0 = arith.constant 0 : i32
    return %arg0, %c0_i32 : i32, i32
  }
}

</mosaic_0001>

<bundles_post_ra>
// kernel: embedding_forward.1
= control target key start
LH: loop header
LB: loop body
LE: loop exit
PB: predicated region body
PF: predicated region fallthrough
CT: control target
= control target key end

     0   :  { %s893_s0 = inlined_call_operand.vmem [shape: s32[16], index: 0, kind: input, shape index: {}]   ;;  %s894_s1 = inlined_call_operand.hbm [shape: f32[128,128], index: 1, kind: input, shape index: {}]   ;;  %s895_s2 = inlined_call_operand.hbm [shape: f32[16,128], index: 2, kind: output, shape index: {}]  }
   0x1   :  { %s7_s11 = sshll.u32 %s893_s0, 4  ;;  %s8_s11 = int_to_ptr.vmem [resolvable:$true] %s7_s11 }
   0x2   :  { %s400_s12 = scalar_lea.vmem %s8_s11, 16  ;;  %p405_p1 = scmp.lt.s32.totalorder %s8_s11, %s8_s11 }
   0x3   :  { %p401_p0 = scmp.ne.s32.totalorder %s8_s11, %s400_s12  ;;  %p406_p2 = scmp.lt.s32.totalorder %s400_s12, %s400_s12 }
   0x5   :  { %p407_p3 = por %p406_p2, %p405_p1 }
   0x7   :  { %p408_p4 = pnand %p407_p3, %p401_p0 }
   0x9   :  { %411 = shalt.err (!%p408_p4)  }
   0xa   :  { %s660_s13 = smov [#allocation5]  }
   0xb   :  { %10 = dma.vmem_to_smem %s8_s11, 16, %s660_s13, [#allocation4] }
   0xc   :  { %626 = dma.done.wait [#allocation4], 16 }
   0xd   :  { %627 = vsyncadd [#allocation4], 4294967280 }
   0xe   :  { %12 = sfence }
   0xf   :  { %13 = vsyncpa [#allocation7], 0 }
  0x10   :  { %15 = vsyncpa [#allocation7 + $0x1], 0  ;;  %s688_s14 = smov 0   ;;  %s690_s15 = smov 0  }
  0x11   :  { %s692_s0 = smov 0  }
  0x12 LB: > { %s335_s16 = sadd.s32 4294967295, %s658_s0   ;;  %s705_s17 = sadd.s32 1, %s658_s0   ;;  %s658_s0 = sphi %s692_s0, %s900_s0   ;;  %s654_s15 = sphi %s690_s15, %s899_s15   ;;  %s650_s14 = sphi %s688_s14, %s898_s14  }
  0x13   : > { %s24_s18 = ssub.s32 %s658_s0, %s705_s17  ;;  %s27_s19 = sadd.s32 1, %s654_s15 }
  0x14   : > { %p25_p5 = scmp.eq.s32.totalorder %s24_s18, 0  ;;  %p336_p6 = scmp.ne.s32.totalorder %s24_s18, 0 }
  0x15   : > { %p31_p7 = scmp.eq.s32.totalorder %s658_s0, 1  ;;  %p36_p8 = scmp.ne.s32.totalorder %s654_s15, %s650_s14 }
  0x16   : > { %s714_s20 = scalar_select %p25_p5, %s654_s15, %s27_s19  }
  0x17   : > { %p716_p9 = por %p336_p6, %p31_p7  ;;  %p37_p10 = scmp.eq.s32.totalorder %s335_s16, 1 }
  0x18   : > { %p337_p12 = scmp.ge.s32.totalorder %s658_s0, 2 }
  0x19   : > { %p720_p11 = por %p37_p10, %p36_p8  ;;  %s51_s23 = sand.u32 (!%p337_p12), 1, %s654_s15  }
  0x1a   : > { %46 = sbr.rel (%p337_p12) target bundleno = 230 (0xe6), region = 12  ;;  %s727_s24 = sshll.u32 (!%p337_p12), %s658_s0, 3 }
  0x1b   : > { %s731_s25 = sshll.u32 (!%p337_p12), %s51_s23, 3  ;;  %s55_s26 = sld [smem:[#allocation5 + %s727_s24]] (!%p337_p12) }
  0x1c   : > { %s661_s27 = smov (!%p337_p12), [#allocation2]   ;;  %s69_s29 = sadd.s32 (!%p337_p12), 1, %s727_s24 }
  0x1d   : > { %s65_s28 = sshll.u32 (!%p337_p12), %s661_s27, 4  ;;  %s737_s30 = sld [smem:[#allocation5 + %s69_s29]] (!%p337_p12)  ;;  %s735_s28 = int_to_ptr.vmem [resolvable:$true] %s65_s28 }
  0x1e   : > { %s86_s3 = sadd.s32 (!%p337_p12), 2, %s727_s24  ;;  %s662_s4 = smov (!%p337_p12), [#allocation2 + $0x1]  }
  0x1f   : > { %s82_s5 = sshll.u32 %s662_s4, 4  ;;  %s740_s6 = sld [smem:[#allocation5 + %s86_s3]]  ;;  %s742_s5 = int_to_ptr.vmem [resolvable:$true] %s82_s5 }
  0x20   : > { %s750_s16 = scalar_lea.hbm %s894_s1, 2048 }
  0x21   : > { %s340_s7 = sshll.u32 %s55_s26, 4 }
  0x22   : > { %s57_s10 = scalar_lea.hbm %s894_s1, %s340_s7 }
  0x23   : > { %s412_s11 = scalar_lea.hbm %s57_s10, 16  ;;  %p415_p0 = scmp.lt.s32.totalorder %s57_s10, %s894_s1 }
  0x24   : > { %p413_p13 = scmp.ne.s32.totalorder %s57_s10, %s412_s11  ;;  %p416_p1 = scmp.lt.s32.totalorder %s750_s16, %s412_s11 }
  0x26   : > { %p417_p2 = por %p416_p1, %p415_p0 }
  0x28   : > { %p418_p3 = pnand %p417_p2, %p413_p13 }
  0x2a   : > { %421 = shalt.err (!%p418_p3)  }
  0x2b   : > { %s422_s26 = scalar_lea.vmem %s735_s28, 16  ;;  %s759_s27 = scalar_lea.vmem %s735_s28, 128 }
  0x2c   : > { %p423_p4 = scmp.ne.s32.totalorder %s735_s28, %s422_s26  ;;  %p427_p5 = scmp.lt.s32.totalorder %s735_s28, %s735_s28 }
  0x2d   : > { %p428_p6 = scmp.lt.s32.totalorder %s759_s27, %s422_s26 }
  0x2f   : > { %p429_p7 = por %p428_p6, %p427_p5 }
  0x31   : > { %p430_p8 = pnand %p429_p7, %p423_p4 }
  0x33   : > { %433 = shalt.err (!%p430_p8)  }
  0x34   : > { %68 = dma.hbm_to_vmem [thread:$0]  %s57_s10, 16, %s735_s28, [#allocation3] }
  0x35   : > { %s341_s29 = sshll.u32 %s737_s30, 4  ;;  %s663_s3 = smov [#allocation2 + $0x2]  }
  0x36   : > { %s99_s4 = sshll.u32 %s663_s3, 4  ;;  %s72_s9 = scalar_lea.hbm %s894_s1, %s341_s29  ;;  %s769_s4 = int_to_ptr.vmem [resolvable:$true] %s99_s4 }
  0x37   : > { %s434_s11 = scalar_lea.hbm %s72_s9, 16  ;;  %p437_p12 = scmp.lt.s32.totalorder %s72_s9, %s894_s1 }
  0x38   : > { %p435_p10 = scmp.ne.s32.totalorder %s72_s9, %s434_s11  ;;  %p438_p13 = scmp.lt.s32.totalorder %s750_s16, %s434_s11 }
  0x3a   : > { %p439_p0 = por %p438_p13, %p437_p12 }
  0x3c   : > { %p440_p1 = pnand %p439_p0, %p435_p10 }
  0x3e   : > { %443 = shalt.err (!%p440_p1)  }
  0x3f   : > { %s444_s30 = scalar_lea.vmem %s742_s5, 16  ;;  %p449_p3 = scmp.lt.s32.totalorder %s742_s5, %s735_s28 }
  0x40   : > { %p445_p2 = scmp.ne.s32.totalorder %s742_s5, %s444_s30  ;;  %p450_p4 = scmp.lt.s32.totalorder %s759_s27, %s444_s30 }
  0x42   : > { %p451_p5 = por %p450_p4, %p449_p3 }
  0x44   : > { %p452_p6 = pnand %p451_p5, %p445_p2 }
  0x46   : > { %455 = shalt.err (!%p452_p6)  }
  0x47   : > { %85 = dma.hbm_to_vmem [thread:$0]  %s72_s9, 16, %s742_s5, [#allocation3 + $0x1] }
  0x48   : > { %s342_s10 = sshll.u32 %s740_s6, 4  ;;  %s103_s18 = sadd.s32 3, %s727_s24 }
  0x49   : > { %s89_s29 = scalar_lea.hbm %s894_s1, %s342_s10  ;;  %s104_s3 = sld [smem:[#allocation5 + %s103_s18]] }
  0x4a   : > { %s456_s7 = scalar_lea.hbm %s89_s29, 16  ;;  %p459_p8 = scmp.lt.s32.totalorder %s89_s29, %s894_s1 }
  0x4b   : > { %p457_p7 = scmp.ne.s32.totalorder %s89_s29, %s456_s7  ;;  %p460_p10 = scmp.lt.s32.totalorder %s750_s16, %s456_s7 }
  0x4d   : > { %p461_p12 = por %p460_p10, %p459_p8 }
  0x4f   : > { %p462_p13 = pnand %p461_p12, %p457_p7 }
  0x51   : > { %465 = shalt.err (!%p462_p13)  }
  0x52   : > { %s466_s5 = scalar_lea.vmem %s769_s4, 16  ;;  %p471_p1 = scmp.lt.s32.totalorder %s769_s4, %s735_s28 }
  0x53   : > { %p467_p0 = scmp.ne.s32.totalorder %s769_s4, %s466_s5  ;;  %p472_p2 = scmp.lt.s32.totalorder %s759_s27, %s466_s5 }
  0x55   : > { %p473_p3 = por %p472_p2, %p471_p1 }
  0x57   : > { %p474_p4 = pnand %p473_p3, %p467_p0 }
  0x59   : > { %477 = shalt.err (!%p474_p4)  }
  0x5a   : > { %102 = dma.hbm_to_vmem [thread:$0]  %s89_s29, 16, %s769_s4, [#allocation3 + $0x2] }
  0x5b   : > { %s120_s6 = sadd.s32 4, %s727_s24  ;;  %s664_s9 = smov [#allocation2 + $0x3]  }
  0x5c   : > { %s116_s12 = sshll.u32 %s664_s9, 4  ;;  %s121_s13 = sld [smem:[#allocation5 + %s120_s6]]  ;;  %s117_s12 = int_to_ptr.vmem [resolvable:$true] %s116_s12 }
  0x5d   : > { %s665_s30 = smov [#allocation2 + $0x4]   ;;  %s137_s18 = sadd.s32 5, %s727_s24 }
  0x5e   : > { %s133_s10 = sshll.u32 %s665_s30, 4  ;;  %s343_s19 = sshll.u32 %s104_s3, 4  ;;  %s798_s10 = int_to_ptr.vmem [resolvable:$true] %s133_s10 }
  0x5f   : > { %s106_s8 = scalar_lea.hbm %s894_s1, %s343_s19  ;;  %s803_s11 = sld [smem:[#allocation5 + %s137_s18]] }
  0x60   : > { %s478_s5 = scalar_lea.hbm %s106_s8, 16  ;;  %p481_p6 = scmp.lt.s32.totalorder %s106_s8, %s894_s1 }
  0x61   : > { %p479_p5 = scmp.ne.s32.totalorder %s106_s8, %s478_s5  ;;  %p482_p7 = scmp.lt.s32.totalorder %s750_s16, %s478_s5 }
  0x63   : > { %p483_p8 = por %p482_p7, %p481_p6 }
  0x65   : > { %p484_p10 = pnand %p483_p8, %p479_p5 }
  0x67   : > { %487 = shalt.err (!%p484_p10)  }
  0x68   : > { %s488_s6 = scalar_lea.vmem %s117_s12, 16  ;;  %p493_p13 = scmp.lt.s32.totalorder %s117_s12, %s735_s28 }
  0x69   : > { %p489_p12 = scmp.ne.s32.totalorder %s117_s12, %s488_s6  ;;  %p494_p0 = scmp.lt.s32.totalorder %s759_s27, %s488_s6 }
  0x6b   : > { %p495_p1 = por %p494_p0, %p493_p13 }
  0x6d   : > { %p496_p2 = pnand %p495_p1, %p489_p12 }
  0x6f   : > { %499 = shalt.err (!%p496_p2)  }
  0x70   : > { %119 = dma.hbm_to_vmem [thread:$0]  %s106_s8, 16, %s117_s12, [#allocation3 + $0x3] }
  0x71   : > { %s344_s3 = sshll.u32 %s121_s13, 4  ;;  %s666_s19 = smov [#allocation2 + $0x5]  }
  0x72   : > { %s123_s18 = scalar_lea.hbm %s894_s1, %s344_s3  ;;  %s150_s26 = sshll.u32 %s666_s19, 4  ;;  %s151_s26 = int_to_ptr.vmem [resolvable:$true] %s150_s26 }
  0x73   : > { %s500_s7 = scalar_lea.hbm %s123_s18, 16  ;;  %p503_p4 = scmp.lt.s32.totalorder %s123_s18, %s894_s1 }
  0x74   : > { %p501_p3 = scmp.ne.s32.totalorder %s123_s18, %s500_s7  ;;  %p504_p5 = scmp.lt.s32.totalorder %s750_s16, %s500_s7 }
  0x76   : > { %p505_p6 = por %p504_p5, %p503_p4 }
  0x78   : > { %p506_p7 = pnand %p505_p6, %p501_p3 }
  0x7a   : > { %509 = shalt.err (!%p506_p7)  }
  0x7b   : > { %s510_s12 = scalar_lea.vmem %s798_s10, 16  ;;  %p515_p10 = scmp.lt.s32.totalorder %s798_s10, %s735_s28 }
  0x7c   : > { %p511_p8 = scmp.ne.s32.totalorder %s798_s10, %s510_s12  ;;  %p516_p12 = scmp.lt.s32.totalorder %s759_s27, %s510_s12 }
  0x7e   : > { %p517_p13 = por %p516_p12, %p515_p10 }
  0x80   : > { %p518_p0 = pnand %p517_p13, %p511_p8 }
  0x82   : > { %521 = shalt.err (!%p518_p0)  }
  0x83   : > { %136 = dma.hbm_to_vmem [thread:$0]  %s123_s18, 16, %s798_s10, [#allocation3 + $0x4] }
  0x84   : > { %s154_s13 = sadd.s32 6, %s727_s24  ;;  %s345_s8 = sshll.u32 %s803_s11, 4 }
  0x85   : > { %s155_s29 = sld [smem:[#allocation5 + %s154_s13]]  ;;  %s140_s9 = scalar_lea.hbm %s894_s1, %s345_s8 }
  0x86   : > { %s522_s30 = scalar_lea.hbm %s140_s9, 16  ;;  %p525_p2 = scmp.lt.s32.totalorder %s140_s9, %s894_s1 }
  0x87   : > { %p523_p1 = scmp.ne.s32.totalorder %s140_s9, %s522_s30  ;;  %p526_p3 = scmp.lt.s32.totalorder %s750_s16, %s522_s30 }
  0x89   : > { %p527_p4 = por %p526_p3, %p525_p2 }
  0x8b   : > { %p528_p5 = pnand %p527_p4, %p523_p1 }
  0x8d   : > { %531 = shalt.err (!%p528_p5)  }
  0x8e   : > { %s532_s5 = scalar_lea.vmem %s151_s26, 16  ;;  %p537_p7 = scmp.lt.s32.totalorder %s151_s26, %s735_s28 }
  0x8f   : > { %p533_p6 = scmp.ne.s32.totalorder %s151_s26, %s532_s5  ;;  %p538_p8 = scmp.lt.s32.totalorder %s759_s27, %s532_s5 }
  0x91   : > { %p539_p10 = por %p538_p8, %p537_p7 }
  0x93   : > { %p540_p12 = pnand %p539_p10, %p533_p6 }
  0x95   : > { %543 = shalt.err (!%p540_p12)  }
  0x96   : > { %153 = dma.hbm_to_vmem [thread:$0]  %s140_s9, 16, %s151_s26, [#allocation3 + $0x5] }
  0x97   : > { %s667_s10 = smov [#allocation2 + $0x6]   ;;  %s171_s18 = sadd.s32 7, %s727_s24 }
  0x98   : > { %s167_s11 = sshll.u32 %s667_s10, 4  ;;  %s172_s4 = sld [smem:[#allocation5 + %s171_s18]]  ;;  %s168_s11 = int_to_ptr.vmem [resolvable:$true] %s167_s11 }
  0x99   : > { %s346_s12 = sshll.u32 %s155_s29, 4  ;;  %s668_s13 = smov [#allocation2 + $0x7]  }
  0x9a   : > { %s184_s8 = sshll.u32 %s668_s13, 4  ;;  %s157_s30 = scalar_lea.hbm %s894_s1, %s346_s12  ;;  %s185_s8 = int_to_ptr.vmem [resolvable:$true] %s184_s8 }
  0x9b   : > { %s544_s19 = scalar_lea.hbm %s157_s30, 16  ;;  %p547_p0 = scmp.lt.s32.totalorder %s157_s30, %s894_s1 }
  0x9c   : > { %p545_p13 = scmp.ne.s32.totalorder %s157_s30, %s544_s19  ;;  %p548_p1 = scmp.lt.s32.totalorder %s750_s16, %s544_s19 }
  0x9e   : > { %p549_p2 = por %p548_p1, %p547_p0 }
  0xa0   : > { %p550_p3 = pnand %p549_p2, %p545_p13 }
  0xa2   : > { %553 = shalt.err (!%p550_p3)  }
  0xa3   : > { %s554_s24 = scalar_lea.vmem %s168_s11, 16  ;;  %p559_p5 = scmp.lt.s32.totalorder %s168_s11, %s735_s28 }
  0xa4   : > { %p555_p4 = scmp.ne.s32.totalorder %s168_s11, %s554_s24  ;;  %p560_p6 = scmp.lt.s32.totalorder %s759_s27, %s554_s24 }
  0xa6   : > { %p561_p7 = por %p560_p6, %p559_p5 }
  0xa8   : > { %p562_p8 = pnand %p561_p7, %p555_p4 }
  0xaa   : > { %565 = shalt.err (!%p562_p8)  }
  0xab   : > { %170 = dma.hbm_to_vmem [thread:$0]  %s157_s30, 16, %s168_s11, [#allocation3 + $0x6] }
  0xac   : > { %s347_s26 = sshll.u32 %s172_s4, 4 }
  0xad   : > { %s174_s10 = scalar_lea.hbm %s894_s1, %s347_s26 }
  0xae   : > { %s566_s18 = scalar_lea.hbm %s174_s10, 16  ;;  %p569_p12 = scmp.lt.s32.totalorder %s174_s10, %s894_s1 }
  0xaf   : > { %p567_p10 = scmp.ne.s32.totalorder %s174_s10, %s566_s18  ;;  %p570_p13 = scmp.lt.s32.totalorder %s750_s16, %s566_s18 }
  0xb1   : > { %p571_p0 = por %p570_p13, %p569_p12 }
  0xb3   : > { %p572_p1 = pnand %p571_p0, %p567_p10 }
  0xb5   : > { %575 = shalt.err (!%p572_p1)  }
  0xb6   : > { %s576_s6 = scalar_lea.vmem %s185_s8, 16  ;;  %p581_p3 = scmp.lt.s32.totalorder %s185_s8, %s735_s28 }
  0xb7   : > { %p577_p2 = scmp.ne.s32.totalorder %s185_s8, %s576_s6  ;;  %p582_p4 = scmp.lt.s32.totalorder %s759_s27, %s576_s6 }
  0xb9   : > { %p583_p5 = por %p582_p4, %p581_p3 }
  0xbb   : > { %p584_p6 = pnand %p583_p5, %p577_p2 }
  0xbd   : > { %587 = shalt.err (!%p584_p6)  }
  0xbe   : > { %187 = dma.hbm_to_vmem [thread:$0]  %s174_s10, 16, %s185_s8, [#allocation3 + $0x7] }
  0xbf   : > { %s53_s11 = scalar_lea.vmem [#allocation6], %s731_s25 }
  0xc0   : > { %628 = dma.done.wait [#allocation3], 16 }
  0xc1   : > { %629 = vsyncadd [#allocation3], 4294967280 }
  0xc2   : > { %630 = dma.done.wait [#allocation3 + $0x1], 16 }
  0xc3   : > { %631 = vsyncadd [#allocation3 + $0x1], 4294967280 }
  0xc4   : > { %632 = dma.done.wait [#allocation3 + $0x2], 16 }
  0xc5   : > { %633 = vsyncadd [#allocation3 + $0x2], 4294967280 }
  0xc6   : > { %634 = dma.done.wait [#allocation3 + $0x3], 16 }
  0xc7   : > { %635 = vsyncadd [#allocation3 + $0x3], 4294967280 }
  0xc8   : > { %636 = dma.done.wait [#allocation3 + $0x4], 16 }
  0xc9   : > { %637 = vsyncadd [#allocation3 + $0x4], 4294967280 }
  0xca   : > { %638 = dma.done.wait [#allocation3 + $0x5], 16 }
  0xcb   : > { %639 = vsyncadd [#allocation3 + $0x5], 4294967280 }
  0xcc   : > { %640 = dma.done.wait [#allocation3 + $0x6], 16 }
  0xcd   : > { %641 = vsyncadd [#allocation3 + $0x6], 4294967280 }
  0xce   : > { %642 = dma.done.wait [#allocation3 + $0x7], 16 }
  0xcf   : > { %643 = vsyncadd [#allocation3 + $0x7], 4294967280  ;;  %s349_s25 = sshll.u32 %s658_s0, 7  ;;  %s221_s28 = sshll.u32 %s53_s11, 4  ;;  %v205_v0 = vld [vmem:[#allocation2] sm:$0xff]  ;;  %s222_s28 = int_to_ptr.vmem [resolvable:$true] %s221_s28 }
  0xd0   : > { %s859_s4 = scalar_lea.hbm %s895_s2, %s349_s25  ;;  %206 = vst [vmem:[%s53_s11] sm:$0xff] %v205_v0  ;;  %s208_s8 = scalar_lea.sflag [#allocation7], %s51_s23 }
  0xd1   : > { %s588_s3 = scalar_lea.vmem %s222_s28, 128  ;;  %s669_s30 = smov [#allocation6]  }
  0xd2   : > { %p589_p7 = scmp.ne.s32.totalorder %s222_s28, %s588_s3  ;;  %s592_s19 = sshll.u32 %s669_s30, 4  ;;  %s593_s19 = int_to_ptr.vmem [resolvable:$false] %s592_s19 }
  0xd3   : > { %s594_s7 = scalar_lea.vmem %s593_s19, 256  ;;  %p595_p12 = scmp.lt.s32.totalorder %s222_s28, %s593_s19 }
  0xd4   : > { %p590_p8 = pnand %p589_p7, %p716_p9  ;;  %p596_p13 = scmp.lt.s32.totalorder %s594_s7, %s588_s3 }
  0xd6   : > { %p591_p10 = pneg %p590_p8  ;;  %p597_p0 = por %p596_p13, %p595_p12 }
  0xd8   : > { %p598_p1 = pnand %p597_p0, %p591_p10 }
  0xda   : > { %601 = shalt.err (!%p598_p1)
}
  0xdb   : > { %s602_s5 = scalar_lea.hbm %s859_s4, 128  ;;  %s606_s26 = scalar_lea.hbm %s895_s2, 256 }
  0xdc   : > { %p603_p2 = scmp.ne.s32.totalorder %s859_s4, %s602_s5  ;;  %p607_p5 = scmp.lt.s32.totalorder %s859_s4, %s895_s2 }
  0xdd   : > { %p608_p6 = scmp.lt.s32.totalorder %s606_s26, %s602_s5 }
  0xde   : > { %p604_p3 = pnand %p603_p2, %p716_p9 }
  0xdf   : > { %p609_p7 = por %p608_p6, %p607_p5 }
  0xe0   : > { %p605_p4 = pneg %p604_p3 }
  0xe2   : > { %p610_p8 = pnand %p609_p7, %p605_p4 }
  0xe4   : > { %613 = shalt.err (!%p610_p8)
}
  0xe5   : > { %360 = dma.vmem_to_hbm [thread:$0]  (%p716_p9), %s222_s28, 128, %s859_s4, %s208_s8  }
  0xe6 PF: > { %p366_p10 = scmp.ge.s32.totalorder %s658_s0, 1  ;;  %s233_s10 = sand.u32 1, %s650_s14  }
  0xe7   : > { %s234_s18 = scalar_lea.sflag [#allocation7], %s233_s10 }
  0xe8   : > { %p363_p12 = pnand %p366_p10, %p720_p11 }
  0xea   : > { %p364_p13 = pneg %p363_p12 }
  0xec   : > { %645 = dma.done.wait (%p364_p13), %s234_s18, 128  }
  0xed   : > { %647 = vsyncadd (%p364_p13), %s234_s18, 4294967168  ;;  %p18_p0 = scmp.ge.s32.totalorder %s705_s17, 3   ;;  %s898_s14 = smov %s654_s15 }
  0xee   : > { %s899_s15 = smov %s714_s20  ;;  %s900_s0 = smov %s705_s17 }
  0xef   :  { %20 = sbr.rel (!%p18_p0) target bundleno = 18 (0x12), region = 105 }
  0xf4   :  { %239 = vsyncpa [#allocation7], 1 }
  0xf5   :  { %241 = vsyncpa [#allocation7 + $0x1], 1 }
  0xf6   :  { %242 = vsyncmov [#allocation3] }
  0xf9   :  { %s243_s0 = vpop.sfrf %242 }
  0xfa   :  { %p352_p9 = scmp.ne.s32.totalorder %s243_s0, 0 }
  0xfc   :  { %247 = shalt.err (%p352_p9)  }
  0xfd   :  { %249 = vsyncmov [#allocation3 + $0x1] }
 0x100   :  { %s250_s21 = vpop.sfrf %249 }
 0x101   :  { %p353_p11 = scmp.ne.s32.totalorder %s250_s21, 0 }
 0x103   :  { %254 = shalt.err (%p353_p11)  }
 0x104   :  { %256 = vsyncmov [#allocation3 + $0x2] }
 0x107   :  { %s257_s22 = vpop.sfrf %256 }
 0x108   :  { %p354_p1 = scmp.ne.s32.totalorder %s257_s22, 0 }
 0x10a   :  { %261 = shalt.err (%p354_p1)  }
 0x10b   :  { %263 = vsyncmov [#allocation3 + $0x3] }
 0x10e   :  { %s264_s12 = vpop.sfrf %263 }
 0x10f   :  { %p355_p2 = scmp.ne.s32.totalorder %s264_s12, 0 }
 0x111   :  { %268 = shalt.err (%p355_p2)  }
 0x112   :  { %270 = vsyncmov [#allocation3 + $0x4] }
 0x115   :  { %s271_s17 = vpop.sfrf %270 }
 0x116   :  { %p356_p3 = scmp.ne.s32.totalorder %s271_s17, 0 }
 0x118   :  { %275 = shalt.err (%p356_p3)  }
 0x119   :  { %277 = vsyncmov [#allocation3 + $0x5] }
 0x11c   :  { %s278_s1 = vpop.sfrf %277 }
 0x11d   :  { %p357_p4 = scmp.ne.s32.totalorder %s278_s1, 0 }
 0x11f   :  { %282 = shalt.err (%p357_p4)  }
 0x120   :  { %284 = vsyncmov [#allocation3 + $0x6] }
 0x123   :  { %s285_s2 = vpop.sfrf %284 }
 0x124   :  { %p358_p5 = scmp.ne.s32.totalorder %s285_s2, 0 }
 0x126   :  { %289 = shalt.err (%p358_p5)  }
 0x127   :  { %291 = vsyncmov [#allocation3 + $0x7] }
 0x12a   :  { %s292_s14 = vpop.sfrf %291 }
 0x12b   :  { %p359_p6 = scmp.ne.s32.totalorder %s292_s14, 0 }
 0x12d   :  { %296 = shalt.err (%p359_p6)  }

</bundles_post_ra>
